<compile_context>
chip_gen: v7x
topology: tpu7x:2x2x1
jax: 0.10.0
libtpu: 0.0.40
codegen_flags: <defaults>
</compile_context>

<pallas_src>
import functools
import math

import jax
import jax.numpy as jnp
from jax.experimental import pallas as pl
from jax.experimental.pallas import tpu as pltpu

# ----- CurricularFace constants (m=0.5, s=64.0) -----
_M = 0.5
_S = 64.0
_COS_M = math.cos(_M)
_SIN_M = math.sin(_M)
_THRESHOLD = math.cos(math.pi - _M)
_MM = math.sin(math.pi - _M) * _M
_EPS = 1e-12  # guards the L2 norms against zero rows/columns


def _curricular_face_kernel(num_classes,
                            emb_ref, w_ref, wtgt_ref, label_ref, t_ref,
                            loss_ref, tnew_ref,
                            embn_scr, cosm_scr, ftl_scr, m_scr, l_scr, tnew_scr):
    j = pl.program_id(0)
    n_tiles = pl.num_programs(0)
    B, D = emb_ref.shape
    tile_c = w_ref.shape[1]

    # ---------------- prologue (runs once, at the first class tile) ----------
    @pl.when(j == 0)
    def _prologue():
        emb = emb_ref[...].astype(jnp.float32)                          # (B, D)
        inv_en = jax.lax.rsqrt(
            jnp.maximum(jnp.sum(emb * emb, axis=1, keepdims=True), _EPS))
        emb_n = emb * inv_en
        embn_scr[...] = emb_n

        # Gathered target columns W[:, label].T -> per-row target logit.
        wt = wtgt_ref[...].astype(jnp.float32)                          # (B, D)
        inv_wn = jax.lax.rsqrt(
            jnp.maximum(jnp.sum(wt * wt, axis=1, keepdims=True), _EPS))
        target = jnp.clip(
            jnp.sum(emb_n * wt, axis=1, keepdims=True) * inv_wn, -1.0, 1.0)

        sin_t = jnp.sqrt(jnp.maximum(1.0 - target * target, 0.0))
        cos_m = target * _COS_M - sin_t * _SIN_M
        cosm_scr[...] = cos_m
        ftl_scr[...] = jnp.where(target > _THRESHOLD, cos_m, target - _MM)

        # t <- mean(target_logit) * 0.01 + 0.99 * t
        t_new = (jnp.sum(target, axis=0, keepdims=True) * (0.01 / B)
                 + 0.99 * t_ref[0, 0])                                  # (1, 1)
        tnew_scr[...] = t_new
        tnew_ref[...] = t_new

        # online-LSE accumulators
        m_scr[...] = jnp.full((B, 1), -jnp.inf, jnp.float32)
        l_scr[...] = jnp.zeros((B, 1), jnp.float32)

    # ------------- streaming pass over one (D, TILE_C) weight slice ----------
    w = w_ref[...]                                                      # (D, TC)
    w32 = w.astype(jnp.float32)
    # fold the column normalization into a post-matmul scale (no W rewrite)
    inv_cn = jax.lax.rsqrt(
        jnp.maximum(jnp.sum(w32 * w32, axis=0, keepdims=True), _EPS))   # (1, TC)

    emb_n = embn_scr[...]
    lhs = emb_n if w.dtype == jnp.float32 else emb_n.astype(w.dtype)
    cos = jnp.dot(lhs, w, preferred_element_type=jnp.float32) * inv_cn
    cos = jnp.clip(cos, -1.0, 1.0)                                      # (B, TC)

    t_new = tnew_scr[...]                                               # (1, 1)
    # hard-example reweighting
    out = jnp.where(cos > cosm_scr[...], cos * (t_new + cos), cos)
    # scatter final_target_logit into the label column of this tile
    col = j * tile_c + jax.lax.broadcasted_iota(jnp.int32, (B, tile_c), 1)
    out = jnp.where(col == label_ref[...], ftl_scr[...], out)
    out = out * _S
    if num_classes % tile_c != 0:
        # mask padded columns of the last (partial) tile
        out = jnp.where(col < num_classes, out, -jnp.inf)

    # online log-sum-exp update
    m_prev = m_scr[...]
    m_new = jnp.maximum(m_prev, jnp.max(out, axis=1, keepdims=True))
    l_scr[...] = (l_scr[...] * jnp.exp(m_prev - m_new)
                  + jnp.sum(jnp.exp(out - m_new), axis=1, keepdims=True))
    m_scr[...] = m_new

    # ---------------- epilogue (last class tile) ------------------------------
    @pl.when(j == n_tiles - 1)
    def _epilogue():
        lse = m_scr[...] + jnp.log(l_scr[...])                          # (B, 1)
        picked = ftl_scr[...] * _S                                      # (B, 1)
        loss_ref[...] = jnp.sum(lse - picked, axis=0, keepdims=True) * (1.0 / B)


def _round_up(x, m):
    return (x + m - 1) // m * m


def _physical_vmem_bytes():
    try:
        info = pltpu.get_tpu_info()
        return int(getattr(info, "vmem_capacity_bytes", 64 << 20))
    except Exception:
        return 64 << 20  # conservative: v7x per-core VMEM


def _pick_tile_c(D, C, w_itemsize):
    # Largest lane-aligned class tile whose double-buffered weight slab fits
    # comfortably in VMEM; re-derived per chip (128 MiB v5e/v6e, 64 MiB v7x).
    budget = _physical_vmem_bytes() // 4
    per_col = max(2 * D * w_itemsize, 1)        # double-buffered (D, 1) column
    tile_c = max(128, (budget // per_col) // 128 * 128)
    return int(min(tile_c, 2048, _round_up(C, 128)))


def _vmem_limit_bytes(B, D, tile_c, w_itemsize):
    tiles = (2 * D * tile_c * w_itemsize        # double-buffered weight blocks
             + 2 * B * D * 4                    # embeddings + emb_n scratch
             + 2 * B * D * max(w_itemsize, 4)   # gathered target columns
             + 8 * B * tile_c * 4)              # (B, TILE_C) temporaries headroom
    limit = max(tiles + (4 << 20), 16 << 20)
    return int(min(limit, _physical_vmem_bytes() - (4 << 20)))


@functools.partial(jax.jit, static_argnames=("tile_c",))
def curricular_face_loss(embeddings, weight, label, t, *, tile_c=None):
    """CurricularFace forward. Returns (mean CE loss, updated `t` buffer)."""
    B, D = embeddings.shape
    Dw, C = weight.shape
    assert D == Dw, (embeddings.shape, weight.shape)

    w_itemsize = jnp.dtype(weight.dtype).itemsize
    if tile_c is None:
        tile_c = _pick_tile_c(D, C, w_itemsize)
    tile_c = int(min(tile_c, _round_up(C, 128)))
    assert tile_c % 128 == 0
    n_tiles = pl.cdiv(C, tile_c)

    label = label.astype(jnp.int32)
    label2d = label.reshape(B, 1)
    t2d = jnp.asarray(t, jnp.float32).reshape(1, 1)
    # Gather the B target columns of W once (B*D elements) so the kernel needs
    # only a single streaming pass over the full weight.
    w_tgt = jnp.take(weight, label, axis=1).T            # (B, D)

    kernel = functools.partial(_curricular_face_kernel, C)

    loss, t_new = pl.pallas_call(
        kernel,
        grid=(n_tiles,),
        in_specs=[
            pl.BlockSpec((B, D), lambda j: (0, 0)),          # embeddings
            pl.BlockSpec((D, tile_c), lambda j: (0, j)),     # streamed W tile
            pl.BlockSpec((B, D), lambda j: (0, 0)),          # gathered target cols
            pl.BlockSpec((B, 1), lambda j: (0, 0)),          # labels
            pl.BlockSpec(memory_space=pltpu.MemorySpace.SMEM),  # t (scalar)
        ],
        out_specs=(pl.BlockSpec((1, 1), lambda j: (0, 0)),
                   pl.BlockSpec((1, 1), lambda j: (0, 0))),
        out_shape=(jax.ShapeDtypeStruct((1, 1), jnp.float32),
                   jax.ShapeDtypeStruct((1, 1), jnp.float32)),
        scratch_shapes=[
            pltpu.VMEM((B, D), jnp.float32),   # normalized embeddings
            pltpu.VMEM((B, 1), jnp.float32),   # cos_theta_m
            pltpu.VMEM((B, 1), jnp.float32),   # final_target_logit
            pltpu.VMEM((B, 1), jnp.float32),   # running max
            pltpu.VMEM((B, 1), jnp.float32),   # running sum-exp
            pltpu.VMEM((1, 1), jnp.float32),   # updated t
        ],
        compiler_params=pltpu.CompilerParams(
            # C is the reduction axis -> "arbitrary" (accumulator-resident outs).
            # TODO(synk): on v7x add a leading "parallel" axis splitting C across
            # the two TensorCores with partial (m, l) outputs + a tiny combine.
            dimension_semantics=("arbitrary",),
            vmem_limit_bytes=_vmem_limit_bytes(B, D, tile_c, w_itemsize),
        ),
    )(embeddings, weight, w_tgt, label2d, t2d)
    return loss[0, 0], t_new[0, 0]


def _reference(embeddings, weight, label, t):
    """Pure-JAX mirror of the PyTorch forward, for correctness checks."""
    emb = embeddings / jnp.linalg.norm(embeddings, axis=1, keepdims=True)
    w = weight / jnp.linalg.norm(weight, axis=0, keepdims=True)
    cos_theta = jnp.clip(emb @ w, -1.0, 1.0)
    B, C = cos_theta.shape
    target_logit = cos_theta[jnp.arange(B), label][:, None]
    sin_theta = jnp.sqrt(jnp.maximum(1.0 - target_logit ** 2, 0.0))
    cos_theta_m = target_logit * _COS_M - sin_theta * _SIN_M
    mask = cos_theta > cos_theta_m
    final_target_logit = jnp.where(target_logit > _THRESHOLD,
                                   cos_theta_m, target_logit - _MM)
    t_new = jnp.mean(target_logit) * 0.01 + 0.99 * t
    output = jnp.where(mask, cos_theta * (t_new + cos_theta), cos_theta)
    onehot = jax.nn.one_hot(label, C, dtype=bool)
    output = jnp.where(onehot, final_target_logit, output)
    output = output * _S
    lse = jax.scipy.special.logsumexp(output, axis=1)
    loss = jnp.mean(lse - output[jnp.arange(B), label])
    return loss, t_new


if __name__ == "__main__":
    # Small shapes: batch=8, in_features=256, out_features (classes)=512.
    # tile_c=128 -> 4 grid steps over the class dimension.
    B, D, C = 8, 256, 512
    key = jax.random.PRNGKey(0)
    k_emb, k_w, k_lbl = jax.random.split(key, 3)

    embeddings = jax.random.normal(k_emb, (B, D), dtype=jnp.float32)
    # init.normal_(self.kernel, std=0.01), shape (in_features, out_features)
    weight = 0.01 * jax.random.normal(k_w, (D, C), dtype=jnp.float32)
    label = jax.random.randint(k_lbl, (B,), 0, C, dtype=jnp.int32)
    t = jnp.zeros((1,), dtype=jnp.float32)  # registered buffer 't'

    # --- f32 weights (exact module semantics) ---
    loss, t_new = curricular_face_loss(embeddings, weight, label, t, tile_c=128)
    loss, t_new = jax.block_until_ready((loss, t_new))
    ref_loss, ref_t = _reference(embeddings, weight, label, t[0])
    assert jnp.allclose(loss, ref_loss, rtol=1e-3, atol=1e-3), (loss, ref_loss)
    assert jnp.allclose(t_new, ref_t, rtol=1e-3, atol=1e-3), (t_new, ref_t)

    # --- bf16-streamed weights (halves HBM traffic for W; f32 accumulation) ---
    w_bf16 = weight.astype(jnp.bfloat16)
    loss_b, t_new_b = curricular_face_loss(embeddings, w_bf16, label, t, tile_c=128)
    loss_b, t_new_b = jax.block_until_ready((loss_b, t_new_b))
    ref_loss_b, ref_t_b = _reference(embeddings, w_bf16.astype(jnp.float32),
                                     label, t[0])
    assert jnp.allclose(loss_b, ref_loss_b, rtol=2e-2, atol=2e-2), (loss_b, ref_loss_b)
    assert jnp.allclose(t_new_b, ref_t_b, rtol=2e-2, atol=2e-2), (t_new_b, ref_t_b)

    print("KERNEL_OK")
</pallas_src>

<mosaic_0001>
module attributes {stable_mosaic.version = 11 : i64} {
  func.func @_curricular_face_kernel(%arg0: i32, %arg1: memref<8x256xf32, #tpu.memory_space<vmem>>, %arg2: memref<256x128xf32, #tpu.memory_space<vmem>>, %arg3: memref<8x256xf32, #tpu.memory_space<vmem>>, %arg4: memref<8x1xi32, #tpu.memory_space<vmem>>, %arg5: memref<1x1xf32, #tpu.memory_space<smem>>, %arg6: memref<1x1xf32, #tpu.memory_space<vmem>>, %arg7: memref<1x1xf32, #tpu.memory_space<vmem>>, %arg8: memref<8x256xf32, #tpu.memory_space<vmem>>, %arg9: memref<8x1xf32, #tpu.memory_space<vmem>>, %arg10: memref<8x1xf32, #tpu.memory_space<vmem>>, %arg11: memref<8x1xf32, #tpu.memory_space<vmem>>, %arg12: memref<8x1xf32, #tpu.memory_space<vmem>>, %arg13: memref<1x1xf32, #tpu.memory_space<vmem>>) attributes {dimension_semantics = [#tpu.dimension_semantics<arbitrary>], iteration_bounds = array<i64: 4>, scalar_prefetch = 0 : i64, scratch_operands = 6 : i64, tpu.core_type = #tpu.core_type<tc>, window_params = [{pipeline_mode = #tpu.pipeline_mode<synchronous>, transform_indices = @transform_0, window_bounds = array<i64: 8, 256>}, {transform_indices = @transform_1, window_bounds = array<i64: 256, 128>}, {pipeline_mode = #tpu.pipeline_mode<synchronous>, transform_indices = @transform_2, window_bounds = array<i64: 8, 256>}, {pipeline_mode = #tpu.pipeline_mode<synchronous>, transform_indices = @transform_3, window_bounds = array<i64: 8, 1>}, {transform_indices = @transform_4, window_bounds = array<i64: 1, 1>}, {pipeline_mode = #tpu.pipeline_mode<synchronous>, transform_indices = @transform_5, window_bounds = array<i64: 1, 1>}, {pipeline_mode = #tpu.pipeline_mode<synchronous>, transform_indices = @transform_6, window_bounds = array<i64: 1, 1>}]} {
    %c0_i32 = arith.constant 0 : i32
    %0 = arith.cmpi eq, %arg0, %c0_i32 : i32
    %1 = arith.extui %0 : i1 to i32
    %c0_i32_0 = arith.constant 0 : i32
    %2 = arith.cmpi ne, %1, %c0_i32_0 : i32
    scf.if %2 {
      %c0_28 = arith.constant 0 : index
      %c0_29 = arith.constant 0 : index
      %58 = vector.load %arg1[%c0_28, %c0_29] : memref<8x256xf32, #tpu.memory_space<vmem>>, vector<8x256xf32>
      %59 = arith.mulf %58, %58 : vector<8x256xf32>
      %cst_30 = arith.constant dense<0.000000e+00> : vector<8xf32>
      %60 = vector.multi_reduction <add>, %59, %cst_30 [1] : vector<8x256xf32> to vector<8xf32>
      %61 = vector.shape_cast %60 : vector<8xf32> to vector<8x1xf32>
      %cst_31 = arith.constant 9.99999996E-13 : f32
      %62 = vector.broadcast %cst_31 : f32 to vector<8x1xf32>
      %63 = arith.maximumf %61, %62 : vector<8x1xf32>
      %64 = math.rsqrt %63 : vector<8x1xf32>
      %65 = vector.broadcast %64 : vector<8x1xf32> to vector<8x256xf32>
      %66 = arith.mulf %58, %65 : vector<8x256xf32>
      %c0_32 = arith.constant 0 : index
      %c0_33 = arith.constant 0 : index
      %67 = vector.load %arg8[%c0_32, %c0_33] : memref<8x256xf32, #tpu.memory_space<vmem>>, vector<8x256xf32>
      tpu.vector_store %arg8[%c0_32, %c0_33], %66 {strides = array<i32>} : memref<8x256xf32, #tpu.memory_space<vmem>>, vector<8x256xf32>,
      %c0_34 = arith.constant 0 : index
      %c0_35 = arith.constant 0 : index
      %68 = vector.load %arg3[%c0_34, %c0_35] : memref<8x256xf32, #tpu.memory_space<vmem>>, vector<8x256xf32>
      %69 = arith.mulf %68, %68 : vector<8x256xf32>
      %cst_36 = arith.constant dense<0.000000e+00> : vector<8xf32>
      %70 = vector.multi_reduction <add>, %69, %cst_36 [1] : vector<8x256xf32> to vector<8xf32>
      %71 = vector.shape_cast %70 : vector<8xf32> to vector<8x1xf32>
      %cst_37 = arith.constant 9.99999996E-13 : f32
      %72 = vector.broadcast %cst_37 : f32 to vector<8x1xf32>
      %73 = arith.maximumf %71, %72 : vector<8x1xf32>
      %74 = math.rsqrt %73 : vector<8x1xf32>
      %75 = arith.mulf %66, %68 : vector<8x256xf32>
      %cst_38 = arith.constant dense<0.000000e+00> : vector<8xf32>
      %76 = vector.multi_reduction <add>, %75, %cst_38 [1] : vector<8x256xf32> to vector<8xf32>
      %77 = vector.shape_cast %76 : vector<8xf32> to vector<8x1xf32>
      %78 = arith.mulf %77, %74 : vector<8x1xf32>
      %cst_39 = arith.constant -1.000000e+00 : f32
      %cst_40 = arith.constant 1.000000e+00 : f32
      %79 = vector.broadcast %cst_39 : f32 to vector<8x1xf32>
      %80 = arith.maximumf %79, %78 : vector<8x1xf32>
      %81 = vector.broadcast %cst_40 : f32 to vector<8x1xf32>
      %82 = arith.minimumf %81, %80 : vector<8x1xf32>
      %83 = arith.mulf %82, %82 : vector<8x1xf32>
      %cst_41 = arith.constant 1.000000e+00 : f32
      %84 = vector.broadcast %cst_41 : f32 to vector<8x1xf32>
      %85 = arith.subf %84, %83 : vector<8x1xf32>
      %cst_42 = arith.constant 0.000000e+00 : f32
      %86 = vector.broadcast %cst_42 : f32 to vector<8x1xf32>
      %87 = arith.maximumf %85, %86 : vector<8x1xf32>
      %88 = math.sqrt %87 : vector<8x1xf32>
      %cst_43 = arith.constant 0.87758255 : f32
      %89 = vector.broadcast %cst_43 : f32 to vector<8x1xf32>
      %90 = arith.mulf %82, %89 : vector<8x1xf32>
      %cst_44 = arith.constant 0.47942555 : f32
      %91 = vector.broadcast %cst_44 : f32 to vector<8x1xf32>
      %92 = arith.mulf %88, %91 : vector<8x1xf32>
      %93 = arith.subf %90, %92 : vector<8x1xf32>
      %c0_45 = arith.constant 0 : index
      %c0_46 = arith.constant 0 : index
      %94 = vector.load %arg9[%c0_45, %c0_46] : memref<8x1xf32, #tpu.memory_space<vmem>>, vector<8x1xf32>
      tpu.vector_store %arg9[%c0_45, %c0_46], %93 {strides = array<i32>} : memref<8x1xf32, #tpu.memory_space<vmem>>, vector<8x1xf32>,
      %cst_47 = arith.constant -0.87758255 : f32
      %95 = vector.broadcast %cst_47 : f32 to vector<8x1xf32>
      %96 = arith.cmpf ogt, %82, %95 : vector<8x1xf32>
      %cst_48 = arith.constant 0.239712775 : f32
      %97 = vector.broadcast %cst_48 : f32 to vector<8x1xf32>
      %98 = arith.subf %82, %97 : vector<8x1xf32>
      %99 = arith.select %96, %93, %98 : vector<8x1xi1>, vector<8x1xf32>
      %c0_49 = arith.constant 0 : index
      %c0_50 = arith.constant 0 : index
      %100 = vector.load %arg10[%c0_49, %c0_50] : memref<8x1xf32, #tpu.memory_space<vmem>>, vector<8x1xf32>
      tpu.vector_store %arg10[%c0_49, %c0_50], %99 {strides = array<i32>} : memref<8x1xf32, #tpu.memory_space<vmem>>, vector<8x1xf32>,
      %cst_51 = arith.constant dense<0.000000e+00> : vector<1xf32>
      %101 = vector.multi_reduction <add>, %82, %cst_51 [0] : vector<8x1xf32> to vector<1xf32>
      %102 = vector.shape_cast %101 : vector<1xf32> to vector<1x1xf32>
      %cst_52 = arith.constant 1.250000e-03 : f32
      %103 = vector.broadcast %cst_52 : f32 to vector<1x1xf32>
      %104 = arith.mulf %102, %103 : vector<1x1xf32>
      %c0_53 = arith.constant 0 : index
      %c0_54 = arith.constant 0 : index
      %105 = memref.load %arg5[%c0_53, %c0_54] : memref<1x1xf32, #tpu.memory_space<smem>>
      %cst_55 = arith.constant 9.900000e-01 : f32
      %106 = arith.mulf %cst_55, %105 : f32
      %107 = vector.broadcast %106 : f32 to vector<1x1xf32>
      %108 = arith.addf %104, %107 : vector<1x1xf32>
      %c0_56 = arith.constant 0 : index
      %c0_57 = arith.constant 0 : index
      %109 = vector.load %arg13[%c0_56, %c0_57] : memref<1x1xf32, #tpu.memory_space<vmem>>, vector<1x1xf32>
      tpu.vector_store %arg13[%c0_56, %c0_57], %108 {strides = array<i32>} : memref<1x1xf32, #tpu.memory_space<vmem>>, vector<1x1xf32>,
      %c0_58 = arith.constant 0 : index
      %c0_59 = arith.constant 0 : index
      %110 = vector.load %arg7[%c0_58, %c0_59] : memref<1x1xf32, #tpu.memory_space<vmem>>, vector<1x1xf32>
      tpu.vector_store %arg7[%c0_58, %c0_59], %108 {strides = array<i32>} : memref<1x1xf32, #tpu.memory_space<vmem>>, vector<1x1xf32>,
      %cst_60 = arith.constant 0xFF800000 : f32
      %111 = vector.broadcast %cst_60 : f32 to vector<8x1xf32>
      %c0_61 = arith.constant 0 : index
      %c0_62 = arith.constant 0 : index
      %112 = vector.load %arg11[%c0_61, %c0_62] : memref<8x1xf32, #tpu.memory_space<vmem>>, vector<8x1xf32>
      tpu.vector_store %arg11[%c0_61, %c0_62], %111 {strides = array<i32>} : memref<8x1xf32, #tpu.memory_space<vmem>>, vector<8x1xf32>,
      %cst_63 = arith.constant 0.000000e+00 : f32
      %113 = vector.broadcast %cst_63 : f32 to vector<8x1xf32>
      %c0_64 = arith.constant 0 : index
      %c0_65 = arith.constant 0 : index
      %114 = vector.load %arg12[%c0_64, %c0_65] : memref<8x1xf32, #tpu.memory_space<vmem>>, vector<8x1xf32>
      tpu.vector_store %arg12[%c0_64, %c0_65], %113 {strides = array<i32>} : memref<8x1xf32, #tpu.memory_space<vmem>>, vector<8x1xf32>,
    } else {
    }
    %c0 = arith.constant 0 : index
    %c0_1 = arith.constant 0 : index
    %3 = vector.load %arg2[%c0, %c0_1] : memref<256x128xf32, #tpu.memory_space<vmem>>, vector<256x128xf32>
    %4 = arith.mulf %3, %3 : vector<256x128xf32>
    %cst = arith.constant dense<0.000000e+00> : vector<128xf32>
    %5 = vector.multi_reduction <add>, %4, %cst [0] : vector<256x128xf32> to vector<128xf32>
    %6 = vector.shape_cast %5 : vector<128xf32> to vector<1x128xf32>
    %cst_2 = arith.constant 9.99999996E-13 : f32
    %7 = vector.broadcast %cst_2 : f32 to vector<1x128xf32>
    %8 = arith.maximumf %6, %7 : vector<1x128xf32>
    %9 = math.rsqrt %8 : vector<1x128xf32>
    %c0_3 = arith.constant 0 : index
    %c0_4 = arith.constant 0 : index
    %10 = vector.load %arg8[%c0_3, %c0_4] : memref<8x256xf32, #tpu.memory_space<vmem>>, vector<8x256xf32>
    %cst_5 = arith.constant dense<0.000000e+00> : vector<8x128xf32>
    %11 = tpu.matmul %10, %3, %cst_5 {dimension_numbers = #tpu.dot_dimension_numbers<[1], [0], [0], [1], [0, 0, 1, 1], [], []>} : vector<8x256xf32>, vector<256x128xf32>, vector<8x128xf32> -> vector<8x128xf32>
    %12 = vector.broadcast %9 : vector<1x128xf32> to vector<8x128xf32>
    %13 = arith.mulf %11, %12 : vector<8x128xf32>
    %cst_6 = arith.constant -1.000000e+00 : f32
    %cst_7 = arith.constant 1.000000e+00 : f32
    %14 = vector.broadcast %cst_6 : f32 to vector<8x128xf32>
    %15 = arith.maximumf %14, %13 : vector<8x128xf32>
    %16 = vector.broadcast %cst_7 : f32 to vector<8x128xf32>
    %17 = arith.minimumf %16, %15 : vector<8x128xf32>
    %c0_8 = arith.constant 0 : index
    %c0_9 = arith.constant 0 : index
    %18 = vector.load %arg13[%c0_8, %c0_9] : memref<1x1xf32, #tpu.memory_space<vmem>>, vector<1x1xf32>
    %c0_10 = arith.constant 0 : index
    %c0_11 = arith.constant 0 : index
    %19 = vector.load %arg9[%c0_10, %c0_11] : memref<8x1xf32, #tpu.memory_space<vmem>>, vector<8x1xf32>
    %20 = vector.broadcast %19 : vector<8x1xf32> to vector<8x128xf32>
    %21 = arith.cmpf ogt, %17, %20 : vector<8x128xf32>
    %22 = vector.broadcast %18 : vector<1x1xf32> to vector<8x128xf32>
    %23 = arith.addf %22, %17 : vector<8x128xf32>
    %24 = arith.mulf %17, %23 : vector<8x128xf32>
    %25 = arith.select %21, %24, %17 : vector<8x128xi1>, vector<8x128xf32>
    %c128_i32 = arith.constant 128 : i32
    %26 = arith.muli %arg0, %c128_i32 : i32
    %27 = tpu.iota {dimensions = array<i32: 1>} : vector<8x128xi32>
    %28 = vector.broadcast %26 : i32 to vector<8x128xi32>
    %29 = arith.addi %28, %27 : vector<8x128xi32>
    %c0_12 = arith.constant 0 : index
    %c0_13 = arith.constant 0 : index
    %30 = vector.load %arg4[%c0_12, %c0_13] : memref<8x1xi32, #tpu.memory_space<vmem>>, vector<8x1xi32>
    %31 = vector.broadcast %30 : vector<8x1xi32> to vector<8x128xi32>
    %32 = arith.cmpi eq, %29, %31 : vector<8x128xi32>
    %c0_14 = arith.constant 0 : index
    %c0_15 = arith.constant 0 : index
    %33 = vector.load %arg10[%c0_14, %c0_15] : memref<8x1xf32, #tpu.memory_space<vmem>>, vector<8x1xf32>
    %34 = vector.shape_cast %33 : vector<8x1xf32> to vector<8x1xf32>
    %35 = vector.broadcast %34 : vector<8x1xf32> to vector<8x128xf32>
    %36 = arith.select %32, %35, %25 : vector<8x128xi1>, vector<8x128xf32>
    %cst_16 = arith.constant 6.400000e+01 : f32
    %37 = vector.broadcast %cst_16 : f32 to vector<8x128xf32>
    %38 = arith.mulf %36, %37 : vector<8x128xf32>
    %c0_17 = arith.constant 0 : index
    %c0_18 = arith.constant 0 : index
    %39 = vector.load %arg11[%c0_17, %c0_18] : memref<8x1xf32, #tpu.memory_space<vmem>>, vector<8x1xf32>
    %cst_19 = arith.constant dense<0xFF800000> : vector<8xf32>
    %40 = vector.multi_reduction <maximumf>, %38, %cst_19 [1] : vector<8x128xf32> to vector<8xf32>
    %41 = vector.shape_cast %40 : vector<8xf32> to vector<8x1xf32>
    %42 = arith.maximumf %39, %41 : vector<8x1xf32>
    %c0_20 = arith.constant 0 : index
    %c0_21 = arith.constant 0 : index
    %43 = vector.load %arg12[%c0_20, %c0_21] : memref<8x1xf32, #tpu.memory_space<vmem>>, vector<8x1xf32>
    %44 = arith.subf %39, %42 : vector<8x1xf32>
    %45 = math.exp %44 : vector<8x1xf32>
    %46 = arith.mulf %43, %45 : vector<8x1xf32>
    %47 = vector.broadcast %42 : vector<8x1xf32> to vector<8x128xf32>
    %48 = arith.subf %38, %47 : vector<8x128xf32>
    %49 = math.exp %48 : vector<8x128xf32>
    %cst_22 = arith.constant dense<0.000000e+00> : vector<8xf32>
    %50 = vector.multi_reduction <add>, %49, %cst_22 [1] : vector<8x128xf32> to vector<8xf32>
    %51 = vector.shape_cast %50 : vector<8xf32> to vector<8x1xf32>
    %52 = arith.addf %46, %51 : vector<8x1xf32>
    %c0_23 = arith.constant 0 : index
    %c0_24 = arith.constant 0 : index
    %53 = vector.load %arg12[%c0_23, %c0_24] : memref<8x1xf32, #tpu.memory_space<vmem>>, vector<8x1xf32>
    tpu.vector_store %arg12[%c0_23, %c0_24], %52 {strides = array<i32>} : memref<8x1xf32, #tpu.memory_space<vmem>>, vector<8x1xf32>,
    %c0_25 = arith.constant 0 : index
    %c0_26 = arith.constant 0 : index
    %54 = vector.load %arg11[%c0_25, %c0_26] : memref<8x1xf32, #tpu.memory_space<vmem>>, vector<8x1xf32>
    tpu.vector_store %arg11[%c0_25, %c0_26], %42 {strides = array<i32>} : memref<8x1xf32, #tpu.memory_space<vmem>>, vector<8x1xf32>,
    %c3_i32 = arith.constant 3 : i32
    %55 = arith.cmpi eq, %arg0, %c3_i32 : i32
    %56 = arith.extui %55 : i1 to i32
    %c0_i32_27 = arith.constant 0 : i32
    %57 = arith.cmpi ne, %56, %c0_i32_27 : i32
    scf.if %57 {
      %c0_28 = arith.constant 0 : index
      %c0_29 = arith.constant 0 : index
      %58 = vector.load %arg11[%c0_28, %c0_29] : memref<8x1xf32, #tpu.memory_space<vmem>>, vector<8x1xf32>
      %c0_30 = arith.constant 0 : index
      %c0_31 = arith.constant 0 : index
      %59 = vector.load %arg12[%c0_30, %c0_31] : memref<8x1xf32, #tpu.memory_space<vmem>>, vector<8x1xf32>
      %60 = math.log %59 : vector<8x1xf32>
      %61 = arith.addf %58, %60 : vector<8x1xf32>
      %c0_32 = arith.constant 0 : index
      %c0_33 = arith.constant 0 : index
      %62 = vector.load %arg10[%c0_32, %c0_33] : memref<8x1xf32, #tpu.memory_space<vmem>>, vector<8x1xf32>
      %cst_34 = arith.constant 6.400000e+01 : f32
      %63 = vector.broadcast %cst_34 : f32 to vector<8x1xf32>
      %64 = arith.mulf %62, %63 : vector<8x1xf32>
      %65 = arith.subf %61, %64 : vector<8x1xf32>
      %cst_35 = arith.constant dense<0.000000e+00> : vector<1xf32>
      %66 = vector.multi_reduction <add>, %65, %cst_35 [0] : vector<8x1xf32> to vector<1xf32>
      %67 = vector.shape_cast %66 : vector<1xf32> to vector<1x1xf32>
      %cst_36 = arith.constant 1.250000e-01 : f32
      %68 = vector.broadcast %cst_36 : f32 to vector<1x1xf32>
      %69 = arith.mulf %67, %68 : vector<1x1xf32>
      %c0_37 = arith.constant 0 : index
      %c0_38 = arith.constant 0 : index
      %70 = vector.load %arg6[%c0_37, %c0_38] : memref<1x1xf32, #tpu.memory_space<vmem>>, vector<1x1xf32>
      tpu.vector_store %arg6[%c0_37, %c0_38], %69 {strides = array<i32>} : memref<1x1xf32, #tpu.memory_space<vmem>>, vector<1x1xf32>,
    } else {
    }
    return
  }
  func.func @transform_0(%arg0: i32) -> (i32, i32) {
    %c0_i32 = arith.constant 0 : i32
    %c0_i32_0 = arith.constant 0 : i32
    %c0_i32_1 = arith.constant 0 : i32
    return %c0_i32, %c0_i32_0 : i32, i32
  }
  func.func @transform_1(%arg0: i32) -> (i32, i32) {
    %c0_i32 = arith.constant 0 : i32
    %c0_i32_0 = arith.constant 0 : i32
    return %c0_i32, %arg0 : i32, i32
  }
  func.func @transform_2(%arg0: i32) -> (i32, i32) {
    %c0_i32 = arith.constant 0 : i32
    %c0_i32_0 = arith.constant 0 : i32
    %c0_i32_1 = arith.constant 0 : i32
    return %c0_i32, %c0_i32_0 : i32, i32
  }
  func.func @transform_3(%arg0: i32) -> (i32, i32) {
    %c0_i32 = arith.constant 0 : i32
    %c0_i32_0 = arith.constant 0 : i32
    %c0_i32_1 = arith.constant 0 : i32
    return %c0_i32, %c0_i32_0 : i32, i32
  }
  func.func @transform_4(%arg0: i32) -> (i32, i32) {
    %c0_i32 = arith.constant 0 : i32
    %c0_i32_0 = arith.constant 0 : i32
    %c0_i32_1 = arith.constant 0 : i32
    return %c0_i32, %c0_i32_0 : i32, i32
  }
  func.func @transform_5(%arg0: i32) -> (i32, i32) {
    %c0_i32 = arith.constant 0 : i32
    %c0_i32_0 = arith.constant 0 : i32
    %c0_i32_1 = arith.constant 0 : i32
    return %c0_i32, %c0_i32_0 : i32, i32
  }
  func.func @transform_6(%arg0: i32) -> (i32, i32) {
    %c0_i32 = arith.constant 0 : i32
    %c0_i32_0 = arith.constant 0 : i32
    %c0_i32_1 = arith.constant 0 : i32
    return %c0_i32, %c0_i32_0 : i32, i32
  }
}

</mosaic_0001>

<bundles_post_ra>
// kernel: curricular_face_loss.1
= control target key start
LH: loop header
LB: loop body
LE: loop exit
PB: predicated region body
PF: predicated region fallthrough
CT: control target
= control target key end

     0   :  { %s1352_s0 = inlined_call_operand.vmem [shape: f32[8,256], index: 0, kind: input, shape index: {}]   ;;  %s1353_s1 = inlined_call_operand.vmem [shape: f32[256,512], index: 1, kind: input, shape index: {}]   ;;  %s1354_s2 = inlined_call_operand.vmem [shape: f32[8,256], index: 2, kind: input, shape index: {}]   ;;  %s1355_s3 = inlined_call_operand.vmem [shape: s32[8,1], index: 3, kind: input, shape index: {}]   ;;  %s1356_s4 = inlined_call_operand.<no memory space> [shape: f32[1,1], index: 4, kind: input, shape index: {}]   ;;  %s1357_s5 = inlined_call_operand.hbm [shape: f32[1,1], index: 5, kind: output, shape index: {0}]   ;;  %s1358_s6 = inlined_call_operand.hbm [shape: f32[1,1], index: 6, kind: output, shape index: {1}]  }
   0x1   :  { %12 = sst [smem:[#allocation8]] %s1356_s4 }
   0x2   :  { %13 = vsyncpa [#allocation11], 0 }
   0x3   :  { %14 = vsyncpa [#allocation13], 0  ;;  %s1071_s23 = smov 0   ;;  %s1073_s24 = smov 0  }
   0x4   :  { %s1075_s25 = smov 0  }
   0x5 LB: > { %s1087_s4 = sadd.s32 4294967295, %s1026_s25   ;;  %s1090_s26 = sadd.s32 1, %s1026_s25   ;;  %s1026_s25 = sphi %s1075_s25, %s1361_s25   ;;  %s1022_s24 = sphi %s1073_s24, %s1360_s24   ;;  %s1018_s23 = sphi %s1071_s23, %s1359_s23  }
   0x6   : > { %s45_s27 = ssub.s32 %s1026_s25, %s1090_s26  ;;  %s48_s28 = sadd.s32 1, %s1022_s24 }
   0x7   : > { %p46_p0 = scmp.eq.s32.totalorder %s45_s27, 0  ;;  %p55_p1 = scmp.ne.s32.totalorder %s1022_s24, %s1018_s23 }
   0x8   : > { %p56_p2 = scmp.eq.s32.totalorder %s1026_s25, 0  ;;  %p802_p4 = scmp.ge.s32.totalorder %s1026_s25, 4 }
   0x9   : > { %s1099_s29 = scalar_select %p46_p0, %s1022_s24, %s48_s28  }
   0xa   : > { %p57_p3 = por %p56_p2, %p55_p1  ;;  %198 = sbr.rel (%p802_p4) target bundleno = 53 (0x35), region = 32 }
  0x11   : > { %201 = sbr.rel (!%p57_p3) target bundleno = 53 (0x35), region = 36  ;;  %s203_s30 = sand.u32 (%p57_p3), 1, %s1022_s24  }
  0x12   : > { %s804_s7 = sshll.u32 (%p57_p3), %s1026_s25, 3  ;;  %s803_s8 = sshll.u32 (%p57_p3), %s203_s30, 8 }
  0x13   : > { %s1107_s11 = scalar_lea.vmem (%p57_p3), %s1353_s1, %s804_s7  ;;  %s1112_s12 = scalar_lea.vmem (%p57_p3), [#allocation9], %s803_s8 }
  0x14   : > { %v297_v0 = vld [vmem:[%s1107_s11] sm:$0xff] (%p57_p3) }
  0x15   : > { %v299_v1 = vld [vmem:[%s1107_s11 + $0x20] sm:$0xff] (%p57_p3)  ;;  %298 = vst [vmem:[%s1112_s12] sm:$0xff] (%p57_p3), %v297_v0 }
  0x16   : > { %v301_v2 = vld [vmem:[%s1107_s11 + $0x40] sm:$0xff] (%p57_p3)  ;;  %300 = vst [vmem:[%s1112_s12 + $0x8] sm:$0xff] (%p57_p3), %v299_v1 }
  0x17   : > { %302 = vst [vmem:[%s1112_s12 + $0x10] sm:$0xff] (%p57_p3), %v301_v2  ;;  %v303_v3 = vld [vmem:[%s1107_s11 + $0x60] sm:$0xff] (%p57_p3) }
  0x18   : > { %v305_v4 = vld [vmem:[%s1107_s11 + $0x80] sm:$0xff]  ;;  %304 = vst [vmem:[%s1112_s12 + $0x18] sm:$0xff] %v303_v3 }
  0x19   : > { %v307_v5 = vld [vmem:[%s1107_s11 + $0xa0] sm:$0xff]  ;;  %306 = vst [vmem:[%s1112_s12 + $0x20] sm:$0xff] %v305_v4 }
  0x1a   : > { %308 = vst [vmem:[%s1112_s12 + $0x28] sm:$0xff] %v307_v5  ;;  %v309_v6 = vld [vmem:[%s1107_s11 + $0xc0] sm:$0xff] }
  0x1b   : > { %v311_v7 = vld [vmem:[%s1107_s11 + $0xe0] sm:$0xff]  ;;  %310 = vst [vmem:[%s1112_s12 + $0x30] sm:$0xff] %v309_v6 }
  0x1c   : > { %v313_v8 = vld [vmem:[%s1107_s11 + $0x100] sm:$0xff]  ;;  %312 = vst [vmem:[%s1112_s12 + $0x38] sm:$0xff] %v311_v7 }
  0x1d   : > { %314 = vst [vmem:[%s1112_s12 + $0x40] sm:$0xff] %v313_v8  ;;  %v315_v9 = vld [vmem:[%s1107_s11 + $0x120] sm:$0xff] }
  0x1e   : > { %v317_v10 = vld [vmem:[%s1107_s11 + $0x140] sm:$0xff]  ;;  %316 = vst [vmem:[%s1112_s12 + $0x48] sm:$0xff] %v315_v9 }
  0x1f   : > { %v319_v11 = vld [vmem:[%s1107_s11 + $0x160] sm:$0xff]  ;;  %318 = vst [vmem:[%s1112_s12 + $0x50] sm:$0xff] %v317_v10 }
  0x20   : > { %320 = vst [vmem:[%s1112_s12 + $0x58] sm:$0xff] %v319_v11  ;;  %v321_v12 = vld [vmem:[%s1107_s11 + $0x180] sm:$0xff] }
  0x21   : > { %v323_v13 = vld [vmem:[%s1107_s11 + $0x1a0] sm:$0xff]  ;;  %322 = vst [vmem:[%s1112_s12 + $0x60] sm:$0xff] %v321_v12 }
  0x22   : > { %v325_v14 = vld [vmem:[%s1107_s11 + $0x1c0] sm:$0xff]  ;;  %324 = vst [vmem:[%s1112_s12 + $0x68] sm:$0xff] %v323_v13 }
  0x23   : > { %326 = vst [vmem:[%s1112_s12 + $0x70] sm:$0xff] %v325_v14  ;;  %v327_v15 = vld [vmem:[%s1107_s11 + $0x1e0] sm:$0xff] }
  0x24   : > { %v329_v16 = vld [vmem:[%s1107_s11 + $0x200] sm:$0xff]  ;;  %328 = vst [vmem:[%s1112_s12 + $0x78] sm:$0xff] %v327_v15 }
  0x25   : > { %v331_v17 = vld [vmem:[%s1107_s11 + $0x220] sm:$0xff]  ;;  %330 = vst [vmem:[%s1112_s12 + $0x80] sm:$0xff] %v329_v16 }
  0x26   : > { %332 = vst [vmem:[%s1112_s12 + $0x88] sm:$0xff] %v331_v17  ;;  %v333_v18 = vld [vmem:[%s1107_s11 + $0x240] sm:$0xff] }
  0x27   : > { %v335_v19 = vld [vmem:[%s1107_s11 + $0x260] sm:$0xff]  ;;  %334 = vst [vmem:[%s1112_s12 + $0x90] sm:$0xff] %v333_v18 }
  0x28   : > { %v337_v20 = vld [vmem:[%s1107_s11 + $0x280] sm:$0xff]  ;;  %336 = vst [vmem:[%s1112_s12 + $0x98] sm:$0xff] %v335_v19 }
  0x29   : > { %338 = vst [vmem:[%s1112_s12 + $0xa0] sm:$0xff] %v337_v20  ;;  %v339_v21 = vld [vmem:[%s1107_s11 + $0x2a0] sm:$0xff] }
  0x2a   : > { %v341_v22 = vld [vmem:[%s1107_s11 + $0x2c0] sm:$0xff]  ;;  %340 = vst [vmem:[%s1112_s12 + $0xa8] sm:$0xff] %v339_v21 }
  0x2b   : > { %v343_v23 = vld [vmem:[%s1107_s11 + $0x2e0] sm:$0xff]  ;;  %342 = vst [vmem:[%s1112_s12 + $0xb0] sm:$0xff] %v341_v22 }
  0x2c   : > { %344 = vst [vmem:[%s1112_s12 + $0xb8] sm:$0xff] %v343_v23  ;;  %v345_v24 = vld [vmem:[%s1107_s11 + $0x300] sm:$0xff] }
  0x2d   : > { %v347_v25 = vld [vmem:[%s1107_s11 + $0x320] sm:$0xff]  ;;  %346 = vst [vmem:[%s1112_s12 + $0xc0] sm:$0xff] %v345_v24 }
  0x2e   : > { %v349_v26 = vld [vmem:[%s1107_s11 + $0x340] sm:$0xff]  ;;  %348 = vst [vmem:[%s1112_s12 + $0xc8] sm:$0xff] %v347_v25 }
  0x2f   : > { %350 = vst [vmem:[%s1112_s12 + $0xd0] sm:$0xff] %v349_v26  ;;  %v351_v27 = vld [vmem:[%s1107_s11 + $0x360] sm:$0xff] }
  0x30   : > { %v353_v28 = vld [vmem:[%s1107_s11 + $0x380] sm:$0xff]  ;;  %352 = vst [vmem:[%s1112_s12 + $0xd8] sm:$0xff] %v351_v27 }
  0x31   : > { %v355_v29 = vld [vmem:[%s1107_s11 + $0x3a0] sm:$0xff]  ;;  %354 = vst [vmem:[%s1112_s12 + $0xe0] sm:$0xff] %v353_v28 }
  0x32   : > { %356 = vst [vmem:[%s1112_s12 + $0xe8] sm:$0xff] %v355_v29  ;;  %v357_v30 = vld [vmem:[%s1107_s11 + $0x3c0] sm:$0xff] }
  0x33   : > { %v359_v31 = vld [vmem:[%s1107_s11 + $0x3e0] sm:$0xff]  ;;  %358 = vst [vmem:[%s1112_s12 + $0xf0] sm:$0xff] %v357_v30 }
  0x34   : > { %360 = vst [vmem:[%s1112_s12 + $0xf8] sm:$0xff] %v359_v31 }
  0x35 PF: > { %p805_p5 = scmp.ge.s32.totalorder %s1026_s25, 1  ;;  %p365_p6 = scmp.lt.s32.totalorder %s1026_s25, 5 }
  0x37   : > { %p366_p7 = pnand %p805_p5, %p365_p6 }
  0x38   : > { %s372_s13 = sand.u32 (!%p366_p7), 1, %s1018_s23   ;;  %p807_p8 = scmp.ne.s32.totalorder (!%p366_p7), %s1087_s4, 0 }
  0x39   : > { %369 = sbr.rel (%p366_p7) target bundleno = 1185 (0x4a1), region = 74  ;;  %s806_s14 = sshll.u32 (!%p366_p7), %s372_s13, 8 }
  0x3a   : > { %s1178_s15 = scalar_lea.vmem (!%p366_p7), [#allocation9], %s806_s14 }
  0x40   : > { %399 = sbr.rel (%p807_p8) target bundleno = 403 (0x193), region = 82  ;;  %v400_v32 = vld [vmem:[%s1352_s0] sm:$0xff] (!%p807_p8)  ;;  %v401_v33 = vld [vmem:[%s1352_s0 + $0x8] sm:$0xff] (!%p807_p8)  ;;  %vm443_vm0 = vcmask (!%p807_p8), 7168   ;;  %v1028_v42 = vmov (!%p807_p8), -inf   ;;  %v1029_v43 = vmov (!%p807_p8), 0.0  }
  0x41   : > { %v402_v34 = vmul.f32 (!%p807_p8), %v400_v32, %v400_v32  ;;  %v403_v35 = vmul.f32 (!%p807_p8), %v401_v33, %v401_v33  ;;  %v413_v37 = vld [vmem:[%s1354_s2] sm:$0xff] (!%p807_p8)  ;;  %v414_v38 = vld [vmem:[%s1354_s2 + $0x8] sm:$0xff] (!%p807_p8)  ;;  %463 = vst.msk [vmem:[#allocation5] sm:$0xff] (!%p807_p8), %vm443_vm0, %v1028_v42  ;;  %464 = vst.msk [vmem:[#allocation6] sm:$0xff] (!%p807_p8), %vm443_vm0, %v1029_v43  ;;  %s456_s25 = sld [smem:[#allocation8]] (!%p807_p8)  ;;  %vm460_vm1 = vcmask (!%p807_p8), 0  }
  0x42   : > { %v415_v39 = vmul.f32 (!%p807_p8), %v413_v37, %v413_v37  ;;  %v416_v40 = vmul.f32 (!%p807_p8), %v414_v38, %v414_v38 }
  0x43   : > { %v404_v36 = vadd.f32 (!%p807_p8), %v403_v35, %v402_v34 }
  0x44   : > { %v417_v41 = vadd.f32 (!%p807_p8), %v416_v40, %v415_v39 }
  0x45   : > { %405 = vadd.xlane.f32.xlu0 (!%p807_p8), %v404_v36 }
  0x47   : > { %s457_s27 = smul.f32 0.99, %s456_s25 }
  0x49   : > { %418 = vadd.xlane.f32.xlu0 %v417_v41  ;;  %v458_v3 = vstv %s457_s27 }
  0xd2   : > { %v406_v44 = vpop.xlane.xlu0 %405 }
  0xd3   : > { %v407_v45 = vmax.f32 %v406_v44, 1e-12 }
  0xd5   : > { %928 = vrsqrt.f32 %v407_v45 }
  0xd6   : > { %v419_v52 = vpop.xlane.xlu0 %418 }
  0xd7   : > { %v420_v53 = vmax.f32 %v419_v52, 1e-12 }
  0xd9   : > { %930 = vrsqrt.f32 %v420_v53 }
  0xdf   : > { %v929_v46 = vpop.eup %928 }
  0xe0   : > { %v409_v47 = vmul.f32 %v929_v46, %v400_v32  ;;  %v410_v48 = vmul.f32 %v929_v46, %v401_v33 }
  0xe2   : > { %412 = vst [vmem:[#allocation2 + $0x8] sm:$0xff] %v410_v48  ;;  %v422_v49 = vmul.f32 %v413_v37, %v409_v47  ;;  %v423_v50 = vmul.f32 %v414_v38, %v410_v48  ;;  %411 = vst [vmem:[#allocation2] sm:$0xff] %v409_v47 }
  0xe3   : > { %v931_v54 = vpop.eup %930 }
  0xe4   : > { %v424_v51 = vadd.f32 %v423_v50, %v422_v49 }
  0xe6   : > { %425 = vadd.xlane.f32.xlu1 %v424_v51 }
 0x173   : > { %v426_v55 = vpop.xlane.xlu1 %425 }
 0x174   : > { %v427_v56 = vmul.f32 %v931_v54, %v426_v55 }
 0x176   : > { %v808_v57 = vclamps-f32 %v427_v56, 1.0 }
 0x178   : > { %v430_v58 = vmul.f32 %v808_v57, %v808_v57  ;;  %v449_v59 = vrot.slane %v808_v57, 4  ;;  %v440_v11 = vmul.f32 0.87758255, %v808_v57  ;;  %v809_v14 = vadd.f32 -0.23971277, %v808_v57 }
 0x179   : > { %vm445_vm4 = vcmp.gt.f32.partialorder %v808_v57, -0.87758255 }
 0x17a   : > { %v431_v60 = vsub.f32 1.0, %v430_v58  ;;  %v450_v61 = vadd.f32 %v808_v57, %v449_v59 }
 0x17c   : > { %v432_v62 = vmax.f32 %v431_v60, 0.0  ;;  %v451_v63 = vrot.slane %v450_v61, 2 }
 0x17e   : > { %932 = vrsqrt.f32 %v432_v62  ;;  %v452_v0 = vadd.f32 %v451_v63, %v450_v61  ;;  %vm435_vm2 = vcmp.eq.f32.partialorder %v432_v62, inf  ;;  %v438_v8 = vand.u32 2147483648, %v432_v62 }
 0x17f   : > { %vm437_vm3 = vcmp.eq.f32.partialorder %v432_v62, 0.0 }
 0x180   : > { %v453_v1 = vrot.slane %v452_v0, 1 }
 0x182   : > { %v454_v2 = vadd.f32 %v453_v1, %v452_v0 }
 0x184   : > { %v455_v4 = vmul.f32 0.00125, %v454_v2 }
 0x186   : > { %v459_v5 = vadd.f32 %v458_v3, %v455_v4 }
 0x188   : > { %v933_v6 = vpop.eup %932  ;;  %461 = vst.msk [vmem:[#allocation7] sm:$0x1] %vm460_vm1, %v459_v5  ;;  %462 = vst.msk [vmem:[#allocation12] sm:$0x1] %vm460_vm1, %v459_v5 }
 0x189   : > { %v434_v7 = vmul.f32 %v933_v6, %v432_v62 }
 0x18b   : > { %v436_v9 = vsel %vm435_vm2, %v432_v62, %v434_v7 }
 0x18c   : > { %v439_v10 = vsel %vm437_vm3, %v438_v8, %v436_v9 }
 0x18d   : > { %v441_v12 = vmul.f32 0.47942555, %v439_v10 }
 0x18f   : > { %v442_v13 = vsub.f32 %v440_v11, %v441_v12 }
 0x191   : > { %444 = vst.msk [vmem:[#allocation3] sm:$0xff] %vm443_vm0, %v442_v13  ;;  %v447_v15 = vsel %vm445_vm4, %v442_v13, %v809_v14 }
 0x192   : > { %448 = vst.msk [vmem:[#allocation4] sm:$0xff] %vm443_vm0, %v447_v15 }
 0x193 PF: > { %v1198_v16 = vld [vmem:[%s1178_s15 + $0x80] sm:$0xff]  ;;  %v1201_v17 = vld [vmem:[%s1178_s15 + $0x88] sm:$0xff]  ;;  %v467_v21 = vld [vmem:[%s1178_s15 + $0x10] sm:$0xff]  ;;  %v1030_v23 = vmov 0   ;;  %s812_s7 = sshll.u32 %s1087_s4, 7  ;;  %vm701_vm7 = vcmask 7168  }
 0x194   : > { %v465_v18 = vld [vmem:[%s1178_s15] sm:$0xff]  ;;  %v855_v19 = vpack.c.bf16 %v1201_v17, %v1198_v16  ;;  %v466_v20 = vld [vmem:[%s1178_s15 + $0x8] sm:$0xff]  ;;  %934 = vset.pattern.permute.xlu0 %v1030_v23  ;;  %v499_v25 = vmul.f32 %v467_v21, %v467_v21  ;;  %935 = vset.pattern.permute.xlu1 %v1030_v23  ;;  %v468_v27 = vld [vmem:[%s1178_s15 + $0x18] sm:$0xff]  ;;  %p813_p9 = scmp.ne.s32.totalorder %s1087_s4, 3 }
 0x195   : > { %v497_v22 = vmul.f32 %v465_v18, %v465_v18  ;;  %v498_v24 = vmul.f32 %v466_v20, %v466_v20  ;;  %v857_v26 = vpack.c.bf16 %v466_v20, %v465_v18  ;;  %v500_v28 = vmul.f32 %v468_v27, %v468_v27  ;;  %v469_v30 = vld [vmem:[%s1178_s15 + $0x20] sm:$0xff]  ;;  %v1211_v33 = vld [vmem:[%s1178_s15 + $0x90] sm:$0xff]  ;;  %v1214_v34 = vld [vmem:[%s1178_s15 + $0x98] sm:$0xff] }
 0x196   : > { %856 = vmatprep.subr.bf16.mxu0 %v855_v19  ;;  %v501_v31 = vmul.f32 %v469_v30, %v469_v30  ;;  %v861_v35 = vpack.c.bf16 %v468_v27, %v467_v21  ;;  %v1217_v36 = vld [vmem:[%s1178_s15 + $0xa0] sm:$0xff]  ;;  %v470_v37 = vld [vmem:[%s1178_s15 + $0x28] sm:$0xff]  ;;  %v859_v38 = vpack.c.bf16 %v1214_v34, %v1211_v33  ;;  %v1228_v43 = vld [vmem:[%s1178_s15 + $0xb0] sm:$0xff]  ;;  %vm724_vm8 = vcmask (!%p813_p9), 0  }
 0x197   : > { %v529_v29 = vadd.f32 %v498_v24, %v497_v22  ;;  %858 = vmatpush3.bf16.msra.mxu0 %v857_v26  ;;  %v1223_v39 = vld [vmem:[%s1178_s15 + $0xa8] sm:$0xff]  ;;  %v502_v40 = vmul.f32 %v470_v37, %v470_v37  ;;  %v1231_v44 = vld [vmem:[%s1178_s15 + $0xb8] sm:$0xff]  ;;  %v471_v45 = vld [vmem:[%s1178_s15 + $0x30] sm:$0xff]  ;;  %v865_v48 = vpack.c.bf16 %v470_v37, %v469_v30 }
 0x198   : > { %v863_v42 = vpack.c.bf16 %v1223_v39, %v1217_v36  ;;  %860 = vmatprep.subr.bf16.mxu0 %v859_v38  ;;  %v503_v46 = vmul.f32 %v471_v45, %v471_v45  ;;  %v569_v49 = vld [vmem:[#allocation2 + $0x8] sm:$0xff]  ;;  %v867_v51 = vpack.c.bf16 %v1231_v44, %v1228_v43  ;;  %v811_v52 = vld [vmem:[#allocation7] ss:$0 sm:$0xff]  ;;  %v668_v53 = vld [vmem:[%s1355_s3] sm:$0xff] }
 0x199   : > { %v530_v32 = vadd.f32 %v529_v29, %v499_v25  ;;  %v472_v50 = vld [vmem:[%s1178_s15 + $0x38] sm:$0xff]  ;;  %v1241_v56 = vld [vmem:[%s1178_s15 + $0xc0] sm:$0xff]  ;;  %v1244_v57 = vld [vmem:[%s1178_s15 + $0xc8] sm:$0xff]  ;;  %634 = vmatprep.mubr.f32.mxu0 %v569_v49  ;;  %657 = vperm.xlu0 %934, %v811_v52   ;;  %v517_v52 = vmul.f32 %v1217_v36, %v1217_v36 }
 0x19a   : > { %v504_v54 = vmul.f32 %v472_v50, %v472_v50  ;;  %v473_v58 = vld [vmem:[%s1178_s15 + $0x40] sm:$0xff]  ;;  %v869_v61 = vpack.c.bf16 %v472_v50, %v471_v45  ;;  %670 = vperm.xlu1 %935, %v668_v53   ;;  %v474_v63 = vld [vmem:[%s1178_s15 + $0x48] sm:$0xff]  ;;  %v871_v0 = vpack.c.bf16 %v1244_v57, %v1241_v56  ;;  %v1251_v4 = vld [vmem:[%s1178_s15 + $0xd0] sm:$0xff]  ;;  %v514_v45 = vmul.f32 %v1201_v17, %v1201_v17 }
 0x19b   : > { %v531_v41 = vadd.f32 %v530_v32, %v500_v28  ;;  %862 = vmatpush3.bf16.msra.mxu0 %v861_v35  ;;  %v505_v59 = vmul.f32 %v473_v58, %v473_v58  ;;  %v644_v62 = vld [vmem:[#allocation3] sm:$0xff]  ;;  %v673_v1 = vld [vmem:[#allocation4] sm:$0xff]  ;;  %v506_v2 = vmul.f32 %v474_v63, %v474_v63  ;;  %v475_v6 = vld [vmem:[%s1178_s15 + $0x50] sm:$0xff]  ;;  %v873_v9 = vpack.c.bf16 %v474_v63, %v473_v58 }
 0x19c   : > { %864 = vmatprep.subr.bf16.mxu0 %v863_v42  ;;  %v1254_v5 = vld [vmem:[%s1178_s15 + $0xd8] sm:$0xff]  ;;  %v507_v7 = vmul.f32 %v475_v6, %v475_v6  ;;  %v493_v14 = vld [vmem:[%s1178_s15 + $0xe0] sm:$0xff]  ;;  %v494_v15 = vld [vmem:[%s1178_s15 + $0xe8] sm:$0xff]  ;;  %v518_v17 = vmul.f32 %v1223_v39, %v1223_v39  ;;  %v520_v58 = vmul.f32 %v1231_v44, %v1231_v44  ;;  %v522_v36 = vmul.f32 %v1244_v57, %v1244_v57 }
 0x19d   : > { %v532_v47 = vadd.f32 %v531_v41, %v501_v31  ;;  %647 = vperm.xlu0 %934, %v644_v62   ;;  %v476_v10 = vld [vmem:[%s1178_s15 + $0x58] sm:$0xff]  ;;  %v875_v11 = vpack.c.bf16 %v1254_v5, %v1251_v4  ;;  %v477_v18 = vld [vmem:[%s1178_s15 + $0x60] sm:$0xff]  ;;  %v478_v22 = vld [vmem:[%s1178_s15 + $0x68] sm:$0xff]  ;;  %v879_v23 = vpack.c.bf16 %v494_v15, %v493_v14  ;;  %v523_v39 = vmul.f32 %v1251_v4, %v1251_v4 }
 0x19e   : > { %676 = vperm.xlu1 %935, %v673_v1   ;;  %v508_v12 = vmul.f32 %v476_v10, %v476_v10  ;;  %v509_v19 = vmul.f32 %v477_v18, %v477_v18  ;;  %v877_v21 = vpack.c.bf16 %v476_v10, %v475_v6  ;;  %v510_v24 = vmul.f32 %v478_v22, %v478_v22  ;;  %v495_v26 = vld [vmem:[%s1178_s15 + $0xf0] sm:$0xff]  ;;  %v496_v27 = vld [vmem:[%s1178_s15 + $0xf8] sm:$0xff] }
 0x19f   : > { %v533_v55 = vadd.f32 %v532_v47, %v502_v40  ;;  %866 = vmatpush3.bf16.msra.mxu0 %v865_v48  ;;  %v479_v28 = vld [vmem:[%s1178_s15 + $0x70] sm:$0xff]  ;;  %v881_v31 = vpack.c.bf16 %v478_v22, %v477_v18  ;;  %v480_v32 = vld [vmem:[%s1178_s15 + $0x78] sm:$0xff]  ;;  %v883_v35 = vpack.c.bf16 %v496_v27, %v495_v26  ;;  %v513_v40 = vmul.f32 %v1198_v16, %v1198_v16 }
 0x1a0   : > { %868 = vmatprep.subr.bf16.mxu0 %v867_v51  ;;  %v511_v29 = vmul.f32 %v479_v28, %v479_v28  ;;  %v512_v37 = vmul.f32 %v480_v32, %v480_v32  ;;  %v885_v42 = vpack.c.bf16 %v480_v32, %v479_v28  ;;  %v515_v48 = vmul.f32 %v1211_v33, %v1211_v33  ;;  %v568_v49 = vld [vmem:[#allocation2] sm:$0xff] }
 0x1a1   : > { %v534_v60 = vadd.f32 %v533_v55, %v503_v46  ;;  %v516_v51 = vmul.f32 %v1214_v34, %v1214_v34  ;;  %v519_v55 = vmul.f32 %v1228_v43, %v1228_v43  ;;  %v521_v34 = vmul.f32 %v1241_v56, %v1241_v56 }
 0x1a2   : > { %v524_v43 = vmul.f32 %v1254_v5, %v1254_v5  ;;  %v526_v44 = vmul.f32 %v494_v15, %v494_v15  ;;  %v528_v56 = vmul.f32 %v496_v27, %v496_v27  ;;  %v664_v18 = vlaneseq }
 0x1a3   : > { %v535_v3 = vadd.f32 %v534_v60, %v504_v54  ;;  %870 = vmatpush3.bf16.msra.mxu0 %v869_v61 }
 0x1a4   : > { %872 = vmatprep.subr.bf16.mxu0 %v871_v0  ;;  %v525_v0 = vmul.f32 %v493_v14, %v493_v14  ;;  %v665_v22 = vand.u32 127, %v664_v18 }
 0x1a5   : > { %v536_v8 = vadd.f32 %v535_v3, %v505_v59  ;;  %v527_v3 = vmul.f32 %v495_v26, %v495_v26 }
 0x1a7   : > { %v537_v13 = vadd.f32 %v536_v8, %v506_v2  ;;  %874 = vmatpush3.bf16.msra.mxu0 %v873_v9 }
 0x1a8   : > { %876 = vmatprep.subr.bf16.mxu0 %v875_v11 }
 0x1a9   : > { %v538_v20 = vadd.f32 %v537_v13, %v507_v7 }
 0x1ab   : > { %v539_v25 = vadd.f32 %v538_v20, %v508_v12  ;;  %878 = vmatpush3.bf16.msra.mxu0 %v877_v21 }
 0x1ac   : > { %880 = vmatprep.subr.bf16.mxu0 %v879_v23  ;;  %v666_v23 = vstv %s812_s7 }
 0x1ad   : > { %v540_v30 = vadd.f32 %v539_v25, %v509_v19  ;;  %v667_v27 = vadd.s32 %v666_v23, %v665_v22 }
 0x1af   : > { %v541_v38 = vadd.f32 %v540_v30, %v510_v24  ;;  %882 = vmatpush3.bf16.msra.mxu0 %v881_v31 }
 0x1b0   : > { %884 = vmatprep.subr.bf16.mxu0 %v883_v35 }
 0x1b1   : > { %v542_v41 = vadd.f32 %v541_v38, %v511_v29 }
 0x1b3   : > { %v543_v46 = vadd.f32 %v542_v41, %v512_v37  ;;  %886 = vmatpush3.bf16.msra.mxu0 %v885_v42  ;;  %v681_v37 = vld [vmem:[#allocation5] sm:$0xff] }
 0x1b5   : > { %v544_v47 = vadd.f32 %v543_v46, %v513_v40 }
 0x1b6   : > { %635 = vmatmul.mubr.f32.vlgmr.msra.gmra.mrb[0].mxu0 %v568_v49 }
 0x1b7   : > { %v545_v50 = vadd.f32 %v544_v47, %v514_v45 }
 0x1b9   : > { %v546_v16 = vadd.f32 %v545_v50, %v515_v48  ;;  %v685_v50 = vld [vmem:[#allocation6] sm:$0xff] }
 0x1bb   : > { %v547_v53 = vadd.f32 %v546_v16, %v516_v51 }
 0x1bd   : > { %v548_v54 = vadd.f32 %v547_v53, %v517_v52 }
 0x1bf   : > { %v549_v33 = vadd.f32 %v548_v54, %v518_v17  ;;  %v713_v17 = vld [vmem:[#allocation4] sm:$0xff] (!%p813_p9) }
 0x1c1   : > { %v550_v59 = vadd.f32 %v549_v33, %v519_v55 }
 0x1c3   : > { %v551_v60 = vadd.f32 %v550_v59, %v520_v58  ;;  %v714_v58 = vmul.f32 (!%p813_p9), 64.0, %v713_v17 }
 0x1c5   : > { %v552_v61 = vadd.f32 %v551_v60, %v521_v34 }
 0x1c7   : > { %v553_v62 = vadd.f32 %v552_v61, %v522_v36 }
 0x1c9   : > { %v554_v63 = vadd.f32 %v553_v62, %v523_v39 }
 0x1cb   : > { %v555_v1 = vadd.f32 %v554_v63, %v524_v43 }
 0x1cd   : > { %v556_v2 = vadd.f32 %v555_v1, %v525_v0 }
 0x1cf   : > { %v557_v6 = vadd.f32 %v556_v2, %v526_v44 }
 0x1d1   : > { %v558_v7 = vadd.f32 %v557_v6, %v527_v3 }
 0x1d3   : > { %v559_v8 = vadd.f32 %v558_v7, %v528_v56 }
 0x1d5   : > { %v560_v57 = vrot.slane %v559_v8, 4 }
 0x1d7   : > { %v561_v9 = vadd.f32 %v560_v57, %v559_v8 }
 0x1d9   : > { %v562_v10 = vrot.slane %v561_v9, 2 }
 0x1db   : > { %v563_v11 = vadd.f32 %v562_v10, %v561_v9 }
 0x1dd   : > { %v564_v4 = vrot.slane %v563_v11, 1 }
 0x1df   : > { %v565_v12 = vadd.f32 %v564_v4, %v563_v11 }
 0x1e1   : > { %v566_v13 = vmax.f32 %v565_v12, 1e-12 }
 0x1e3   : > { %936 = vrsqrt.f32 %v566_v13 }
 0x1ed   : > { %v937_v14 = vpop.eup %936 }
 0x218   : > { %v658_v20 = vpop.permute.xlu0 %657 }
 0x219   : > { %v671_v25 = vpop.permute.xlu1 %670 }
 0x21a   : > { %vm672_vm6 = vcmp.eq.s32.totalorder %v667_v27, %v671_v25 }
 0x21c   : > { %v648_v28 = vpop.permute.xlu0 %647 }
 0x21d   : > { %v677_v31 = vpop.permute.xlu1 %676 }
 0x289   : > { %v852_v5 = vpop.f32.mrb[0].mxu0 }
 0x28a   : > { %v853_v19 = vpop.f32.mrb[1].mxu0 }
 0x28b   : > { %v854_v15 = vadd.f32 %v853_v19, %v852_v5 }
 0x28d   : > { %v640_v21 = vmul.f32 %v937_v14, %v854_v15 }
 0x28f   : > { %v810_v24 = vclamps-f32 %v640_v21, 1.0 }
 0x291   : > { %v660_v26 = vadd.f32 %v810_v24, %v658_v20  ;;  %vm650_vm5 = vcmp.gt.f32.partialorder %v810_v24, %v648_v28 }
 0x293   : > { %v661_v29 = vmul.f32 %v810_v24, %v660_v26 }
 0x295   : > { %v662_v30 = vsel %vm650_vm5, %v661_v29, %v810_v24 }
 0x296   : > { %v679_v32 = vsel %vm672_vm6, %v677_v31, %v662_v30 }
 0x297   : > { %v680_v35 = vmul.f32 64.0, %v679_v32 }
 0x299   : > { %682 = vmax.xlane.f32.xlu0 %v680_v35 }
 0x326   : > { %v683_v38 = vpop.xlane.xlu0 %682 }
 0x327   : > { %v684_v40 = vmax.f32 %v681_v37, %v683_v38 }
 0x329   : > { %v686_v41 = vsub.f32 %v681_v37, %v684_v40  ;;  %703 = vst.msk [vmem:[#allocation5] sm:$0xff] %vm701_vm7, %v684_v40  ;;  %692 = vperm.xlu1 %935, %v684_v40  }
 0x32b   : > { %v687_v48 = vmul.f32 1.442695, %v686_v41 }
 0x330   : > { %v708_v55 = vld [vmem:[#allocation5] sm:$0xff] (!%p813_p9) }
 0x3a8   : > { %v693_v42 = vpop.permute.xlu1 %692 }
 0x3a9   : > { %v695_v45 = vsub.f32 %v680_v35, %v693_v42 }
 0x3ab   : > { %v696_v46 = vmul.f32 1.442695, %v695_v45 }
 0x3ad   : > { %938 = vpow2.f32 %v696_v46 }
 0x3ae   : > { %940 = vpow2.f32 %v687_v48 }
 0x3b7   : > { %v939_v47 = vpop.eup %938 }
 0x3b8   : > { %698 = vadd.xlane.f32.xlu1 %v939_v47  ;;  %v941_v49 = vpop.eup %940 }
 0x3b9   : > { %v689_v51 = vmul.f32 %v941_v49, %v685_v50 }
 0x442   : > { %707 = sbr.rel (%p813_p9) target bundleno = 1137 (0x471), region = 86 }
 0x445   : > { %v699_v16 = vpop.xlane.xlu1 %698 }
 0x446   : > { %v700_v52 = vadd.f32 %v699_v16, %v689_v51 }
 0x448   : > { %702 = vst.msk [vmem:[#allocation6] sm:$0xff] %vm701_vm7, %v700_v52 }
 0x44f   : > { %v709_v53 = vld [vmem:[#allocation6] sm:$0xff] }
 0x450   : > { %942 = vlog2.f32 %v709_v53 }
 0x45a   : > { %v943_v54 = vpop.eup %942 }
 0x45b   : > { %v711_v33 = vmul.f32 0.6931472, %v943_v54 }
 0x45d   : > { %v712_v59 = vadd.f32 %v711_v33, %v708_v55 }
 0x45f   : > { %v715_v34 = vsub.f32 %v712_v59, %v714_v58 }
 0x461   : > { %v716_v60 = vsel %vm701_vm7, %v715_v34, 0.0 }
 0x462   : > { %v717_v36 = vrot.slane %v716_v60, 4 }
 0x464   : > { %v718_v61 = vadd.f32 %v717_v36, %v716_v60 }
 0x466   : > { %v719_v39 = vrot.slane %v718_v61, 2 }
 0x468   : > { %v720_v62 = vadd.f32 %v719_v39, %v718_v61 }
 0x46a   : > { %v721_v43 = vrot.slane %v720_v62, 1 }
 0x46c   : > { %v722_v63 = vadd.f32 %v721_v43, %v720_v62 }
 0x46e   : > { %v723_v0 = vmul.f32 0.125, %v722_v63 }
 0x470   : > { %725 = vst.msk [vmem:[#allocation10] sm:$0x1] %vm724_vm8, %v723_v0 }
 0x471 PF: > { %p895_p10 = scmp.eq.s32.totalorder %s1087_s4, 3  ;;  %s1031_s8 = smov [#allocation10]  }
 0x472   : > { %s733_s9 = sshll.u32 %s1031_s8, 4  ;;  %s1032_s10 = smov [#allocation12]   ;;  %s734_s9 = int_to_ptr.vmem [resolvable:$true] %s733_s9 }
 0x473   : > { %s744_s11 = sshll.u32 %s1032_s10, 4  ;;  %s944_s12 = scalar_lea.vmem %s734_s9, 16  ;;  %s745_s11 = int_to_ptr.vmem [resolvable:$true] %s744_s11 }
 0x474   : > { %p945_p11 = scmp.ne.s32.totalorder %s734_s9, %s944_s12  ;;  %s950_s13 = scalar_lea.vmem %s734_s9, 32 }
 0x475   : > { %p951_p0 = scmp.lt.s32.totalorder %s734_s9, %s734_s9  ;;  %p952_p1 = scmp.lt.s32.totalorder %s950_s13, %s944_s12 }
 0x476   : > { %p946_p12 = pnand %p945_p11, %p895_p10 }
 0x477   : > { %p953_p2 = por %p952_p1, %p951_p0 }
 0x478   : > { %p947_p13 = pneg %p946_p12 }
 0x47a   : > { %p954_p3 = pnand %p953_p2, %p947_p13 }
 0x47c   : > { %957 = shalt.err (!%p954_p3)
}
 0x47d   : > { %s958_s16 = scalar_lea.hbm %s1357_s5, 16 }
 0x47e   : > { %p959_p4 = scmp.ne.s32.totalorder %s1357_s5, %s958_s16  ;;  %p964_p7 = scmp.lt.u32.totalorder %s958_s16, %s1357_s5 }
 0x480   : > { %p960_p5 = pnand %p959_p4, %p895_p10 }
 0x482   : > { %p961_p6 = pneg %p960_p5 }
 0x484   : > { %p966_p8 = pnand %p964_p7, %p961_p6 }
 0x486   : > { %969 = shalt.err (!%p966_p8)
}
 0x487   : > { %888 = dma.vmem_to_hbm [thread:$0]  (%p895_p10), %s734_s9, 16, %s1357_s5, [#allocation11]  }
 0x488   : > { %s970_s23 = scalar_lea.vmem %s745_s11, 16  ;;  %s976_s25 = scalar_lea.vmem %s745_s11, 32 }
 0x489   : > { %p971_p9 = scmp.ne.s32.totalorder %s745_s11, %s970_s23  ;;  %p977_p13 = scmp.lt.s32.totalorder %s745_s11, %s745_s11 }
 0x48a   : > { %p978_p0 = scmp.lt.s32.totalorder %s976_s25, %s970_s23 }
 0x48b   : > { %p972_p11 = pnand %p971_p9, %p895_p10 }
 0x48c   : > { %p979_p1 = por %p978_p0, %p977_p13 }
 0x48d   : > { %p973_p12 = pneg %p972_p11 }
 0x48f   : > { %p980_p2 = pnand %p979_p1, %p973_p12 }
 0x491   : > { %983 = shalt.err (!%p980_p2)
}
 0x492   : > { %s984_s30 = scalar_lea.hbm %s1358_s6, 16 }
 0x493   : > { %p985_p3 = scmp.ne.s32.totalorder %s1358_s6, %s984_s30  ;;  %p990_p6 = scmp.lt.u32.totalorder %s984_s30, %s1358_s6 }
 0x495   : > { %p986_p4 = pnand %p985_p3, %p895_p10 }
 0x497   : > { %p987_p5 = pneg %p986_p4 }
 0x499   : > { %p992_p7 = pnand %p990_p6, %p987_p5 }
 0x49b   : > { %995 = shalt.err (!%p992_p7)
}
 0x49c   : > { %890 = dma.vmem_to_hbm [thread:$0]  (%p895_p10), %s745_s11, 16, %s1358_s6, [#allocation13]  }
 0x49d   : > { %1009 = dma.done.wait (%p895_p10), [#allocation11], 16  }
 0x49e   : > { %1011 = vsyncadd (%p895_p10), [#allocation11], 4294967280 }
 0x49f   : > { %1013 = dma.done.wait (%p895_p10), [#allocation13], 16  }
 0x4a0   : > { %1015 = vsyncadd (%p895_p10), [#allocation13], 4294967280 }
 0x4a1 PF: > { %p17_p8 = scmp.ge.s32.totalorder %s1090_s26, 6   ;;  %s1359_s23 = smov %s1022_s24 }
 0x4a2   : > { %s1360_s24 = smov %s1099_s29  ;;  %s1361_s25 = smov %s1090_s26 }
 0x4a3   :  { %19 = sbr.rel (!%p17_p8) target bundleno = 5 (0x5), region = 126 }
 0x4aa   :  { %761 = vsyncpa [#allocation11], 1 }
 0x4ab   :  { %763 = vsyncpa [#allocation11 + $0x1], 1 }
 0x4ac   :  { %764 = vsyncpa [#allocation13], 1 }

</bundles_post_ra>
